<compile_context>
chip_gen: v6e
topology: v6e:2x2x1
jax: 0.10.0
libtpu: 0.0.40
codegen_flags: <defaults>
</compile_context>

<pallas_src>
import functools

import jax
import jax.numpy as jnp
from jax import lax
from jax.experimental import pallas as pl
from jax.experimental.pallas import tpu as pltpu


def _round_up(x, m):
    return ((x + m - 1) // m) * m


# ----------------------------- tiled linear (y = x @ w.T + b) -----------------------------


def _linear_kernel(x_ref, w_ref, b_ref, o_ref, acc_ref):
    # x: (tm, tk), w: (tn, tk)  (PyTorch nn.Linear weight layout), b: (1, tn)
    k = pl.program_id(2)

    @pl.when(k == 0)
    def _():
        acc_ref[...] = jnp.zeros_like(acc_ref)

    # Contract on K of the (N, K) weight directly -- no in-kernel transpose.
    # bf16 MXU operands, f32 accumulation.
    acc_ref[...] += lax.dot_general(
        x_ref[...].astype(jnp.bfloat16),
        w_ref[...].astype(jnp.bfloat16),
        (((1,), (1,)), ((), ())),
        preferred_element_type=jnp.float32,
    )

    @pl.when(k == pl.num_programs(2) - 1)
    def _():
        o_ref[...] = (acc_ref[...] + b_ref[...]).astype(o_ref.dtype)


def pallas_linear(x, w, b, *, tm=256, tn=256, tk=512):
    """y = x @ w.T + b with x:(M,K), w:(N,K), b:(N,) -> y:(M,N)."""
    M, K = x.shape
    N = w.shape[0]

    # Clamp tiles to the (padded) problem size; keep N/K tiles 128-aligned
    # (256/512 defaults fill the wider v6e/v7x MXU; fine on v5e too).
    tm = min(tm, _round_up(M, 8))
    tn = min(tn, _round_up(N, 128))
    tk = min(tk, _round_up(K, 128))
    Mp, Np, Kp = _round_up(M, tm), _round_up(N, tn), _round_up(K, tk)

    x_p = jnp.pad(x, ((0, Mp - M), (0, Kp - K))) if (Mp, Kp) != (M, K) else x
    w_p = jnp.pad(w, ((0, Np - N), (0, Kp - K))) if (Np, Kp) != (N, K) else w
    b_p = jnp.pad(b.reshape(1, N), ((0, 0), (0, Np - N)))

    out = pl.pallas_call(
        _linear_kernel,
        out_shape=jax.ShapeDtypeStruct((Mp, Np), x.dtype),
        grid_spec=pltpu.PrefetchScalarGridSpec(
            num_scalar_prefetch=0,
            grid=(Mp // tm, Np // tn, Kp // tk),
            in_specs=[
                pl.BlockSpec((tm, tk), lambda i, j, k: (i, k)),
                pl.BlockSpec((tn, tk), lambda i, j, k: (j, k)),
                pl.BlockSpec((1, tn), lambda i, j, k: (0, j)),
            ],
            out_specs=pl.BlockSpec((tm, tn), lambda i, j, k: (i, j)),
            scratch_shapes=[pltpu.VMEM((tm, tn), jnp.float32)],
        ),
        compiler_params=pltpu.CompilerParams(
            dimension_semantics=("parallel", "parallel", "arbitrary"),
            vmem_limit_bytes=32 * 1024 * 1024,
        ),
    )(x_p, w_p, b_p)
    return out[:M, :N]


# ----------------------------- per-batch multi-head attention -----------------------------


def _attn_kernel(qkv_ref, o_ref, *, num_heads, head_dim, scale):
    # qkv_ref: (1, S, 3E) packed [q | k | v] for one batch; o_ref: (1, S, E) merged heads.
    E = num_heads * head_dim
    qkv = qkv_ref[0].astype(jnp.float32)  # (S, 3E)

    outs = []
    for h in range(num_heads):  # unrolled; H is small and static
        lo = h * head_dim
        q = qkv[:, lo:lo + head_dim] * scale            # scale folded into q (S*Dh elems)
        k = qkv[:, E + lo:E + lo + head_dim]
        v = qkv[:, 2 * E + lo:2 * E + lo + head_dim]

        # scores = q @ k.T on the MXU (bf16 operands, f32 accumulation).
        s = lax.dot_general(
            q.astype(jnp.bfloat16), k.astype(jnp.bfloat16),
            (((1,), (1,)), ((), ())),
            preferred_element_type=jnp.float32)          # (S, S)

        # f32 softmax; divide replaced by EUP approx reciprocal.
        m = jnp.max(s, axis=-1, keepdims=True)
        p = jnp.exp(s - m)
        l = jnp.sum(p, axis=-1, keepdims=True)

        o = lax.dot_general(
            p.astype(jnp.bfloat16), v.astype(jnp.bfloat16),
            (((1,), (0,)), ((), ())),
            preferred_element_type=jnp.float32)          # (S, Dh)
        outs.append(o * pl.reciprocal(l, approx=True))

    # Single lane-dense store of the merged-head (S, E) slab (no wrapper merge transpose).
    o_ref[0] = jnp.concatenate(outs, axis=-1).astype(o_ref.dtype)
    # TODO(synk): for long sequences, add a KV-block grid axis with online softmax
    # (flash-style m/l/acc scratch) so VMEM stays O(S*Dh) instead of O(S^2).


def pallas_mhsa(qkv, num_heads, head_dim):
    """qkv: (B, S, 3E) packed projections -> (B, S, E) merged-head attention output."""
    B, S, E3 = qkv.shape
    E = num_heads * head_dim
    scale = 1.0 / float(head_dim) ** 0.5
    return pl.pallas_call(
        functools.partial(_attn_kernel, num_heads=num_heads,
                          head_dim=head_dim, scale=scale),
        out_shape=jax.ShapeDtypeStruct((B, S, E), qkv.dtype),
        grid=(B,),
        in_specs=[pl.BlockSpec((1, S, E3), lambda b: (b, 0, 0))],
        out_specs=pl.BlockSpec((1, S, E), lambda b: (b, 0, 0)),
        compiler_params=pltpu.CompilerParams(
            dimension_semantics=("parallel",),
            vmem_limit_bytes=32 * 1024 * 1024,
        ),
    )(qkv)


# ------------------------------- module glue -------------------------------


def init_self_attention_params(key, embed_dim):
    """Deterministic synthetic params matching nn.MultiheadAttention shapes."""
    k1, k2 = jax.random.split(key)
    scale = 0.02
    return {
        # packed q/k/v projection: (3E, E) weight, (3E,) bias
        "in_proj_weight": scale
        * jax.random.normal(k1, (3 * embed_dim, embed_dim), jnp.float32),
        "in_proj_bias": jnp.zeros((3 * embed_dim,), jnp.float32),
        # output projection: (E, E) weight, (E,) bias
        "out_proj_weight": scale
        * jax.random.normal(k2, (embed_dim, embed_dim), jnp.float32),
        "out_proj_bias": jnp.zeros((embed_dim,), jnp.float32),
    }


def self_attention_forward(x, params, num_heads):
    """x: (B, S, E) -> attn_output: (B, S, E). (attention weights are discarded,
    matching the PyTorch module.)"""
    B, S, E = x.shape
    H = num_heads
    Dh = E // H
    assert Dh * H == E, "embed_dim must be divisible by num_heads"

    # Packed QKV projection (tiled, pipelined matmul).
    x2d = x.reshape(B * S, E)
    qkv = pallas_linear(x2d, params["in_proj_weight"], params["in_proj_bias"])
    qkv = qkv.reshape(B, S, 3 * E)  # free reshape; no head-split transpose needed

    # Per-batch multi-head attention; heads split/merged inside the kernel.
    attn = pallas_mhsa(qkv, H, Dh)  # (B, S, E)

    # Output projection (tiled, pipelined matmul).
    out = pallas_linear(attn.reshape(B * S, E),
                        params["out_proj_weight"], params["out_proj_bias"])
    return out.reshape(B, S, E)


if __name__ == "__main__":
    B, S, E, H = 2, 8, 32, 4  # batch, seq, embed_dim, num_heads

    key = jax.random.PRNGKey(0)
    kx, kp = jax.random.split(key)
    x = jax.random.normal(kx, (B, S, E), jnp.float32)
    params = init_self_attention_params(kp, E)

    fwd = jax.jit(functools.partial(self_attention_forward, num_heads=H))
    y = fwd(x, params)
    jax.block_until_ready(y)
    assert y.shape == (B, S, E)
    print("KERNEL_OK")
</pallas_src>

<mosaic_0001>
module attributes {stable_mosaic.version = 11 : i64} {
  func.func @_linear_kernel(%arg0: i32, %arg1: i32, %arg2: i32, %arg3: memref<16x128xf32, #tpu.memory_space<vmem>>, %arg4: memref<128x128xf32, #tpu.memory_space<vmem>>, %arg5: memref<1x128xf32, #tpu.memory_space<vmem>>, %arg6: memref<16x128xf32, #tpu.memory_space<vmem>>, %arg7: memref<16x128xf32, #tpu.memory_space<vmem>>) attributes {dimension_semantics = [#tpu.dimension_semantics<parallel>, #tpu.dimension_semantics<parallel>, #tpu.dimension_semantics<arbitrary>], iteration_bounds = array<i64: 1, 1, 1>, scalar_prefetch = 0 : i64, scratch_operands = 1 : i64, tpu.core_type = #tpu.core_type<tc>, window_params = [{transform_indices = @transform_0, window_bounds = array<i64: 16, 128>}, {transform_indices = @transform_1, window_bounds = array<i64: 128, 128>}, {transform_indices = @transform_2, window_bounds = array<i64: 1, 128>}, {transform_indices = @transform_3, window_bounds = array<i64: 16, 128>}]} {
    %c0_i32 = arith.constant 0 : i32
    %0 = arith.cmpi eq, %arg2, %c0_i32 : i32
    %1 = arith.extui %0 : i1 to i32
    %c0_i32_0 = arith.constant 0 : i32
    %2 = arith.cmpi ne, %1, %c0_i32_0 : i32
    scf.if %2 {
      %cst_10 = arith.constant 0.000000e+00 : f32
      %14 = vector.broadcast %cst_10 : f32 to vector<16x128xf32>
      %c0_11 = arith.constant 0 : index
      %c0_12 = arith.constant 0 : index
      %15 = vector.load %arg7[%c0_11, %c0_12] : memref<16x128xf32, #tpu.memory_space<vmem>>, vector<16x128xf32>
      tpu.vector_store %arg7[%c0_11, %c0_12], %14 {strides = array<i32>} : memref<16x128xf32, #tpu.memory_space<vmem>>, vector<16x128xf32>,
    } else {
    }
    %c0 = arith.constant 0 : index
    %c0_1 = arith.constant 0 : index
    %3 = vector.load %arg7[%c0, %c0_1] : memref<16x128xf32, #tpu.memory_space<vmem>>, vector<16x128xf32>
    %c0_2 = arith.constant 0 : index
    %c0_3 = arith.constant 0 : index
    %4 = vector.load %arg3[%c0_2, %c0_3] : memref<16x128xf32, #tpu.memory_space<vmem>>, vector<16x128xf32>
    %5 = arith.truncf %4 : vector<16x128xf32> to vector<16x128xbf16>
    %c0_4 = arith.constant 0 : index
    %c0_5 = arith.constant 0 : index
    %6 = vector.load %arg4[%c0_4, %c0_5] : memref<128x128xf32, #tpu.memory_space<vmem>>, vector<128x128xf32>
    %7 = arith.truncf %6 : vector<128x128xf32> to vector<128x128xbf16>
    %cst = arith.constant dense<0.000000e+00> : vector<16x128xf32>
    %8 = tpu.matmul %5, %7, %cst {dimension_numbers = #tpu.dot_dimension_numbers<[1], [1], [0], [0], [0, 0, 1, 0], [], []>} : vector<16x128xbf16>, vector<128x128xbf16>, vector<16x128xf32> -> vector<16x128xf32>
    %9 = arith.addf %3, %8 : vector<16x128xf32>
    %c0_6 = arith.constant 0 : index
    %c0_7 = arith.constant 0 : index
    %10 = vector.load %arg7[%c0_6, %c0_7] : memref<16x128xf32, #tpu.memory_space<vmem>>, vector<16x128xf32>
    tpu.vector_store %arg7[%c0_6, %c0_7], %9 {strides = array<i32>} : memref<16x128xf32, #tpu.memory_space<vmem>>, vector<16x128xf32>,
    %c0_i32_8 = arith.constant 0 : i32
    %11 = arith.cmpi eq, %arg2, %c0_i32_8 : i32
    %12 = arith.extui %11 : i1 to i32
    %c0_i32_9 = arith.constant 0 : i32
    %13 = arith.cmpi ne, %12, %c0_i32_9 : i32
    scf.if %13 {
      %c0_10 = arith.constant 0 : index
      %c0_11 = arith.constant 0 : index
      %14 = vector.load %arg7[%c0_10, %c0_11] : memref<16x128xf32, #tpu.memory_space<vmem>>, vector<16x128xf32>
      %c0_12 = arith.constant 0 : index
      %c0_13 = arith.constant 0 : index
      %15 = vector.load %arg5[%c0_12, %c0_13] : memref<1x128xf32, #tpu.memory_space<vmem>>, vector<1x128xf32>
      %16 = vector.broadcast %15 : vector<1x128xf32> to vector<16x128xf32>
      %17 = arith.addf %14, %16 : vector<16x128xf32>
      %c0_14 = arith.constant 0 : index
      %c0_15 = arith.constant 0 : index
      %18 = vector.load %arg6[%c0_14, %c0_15] : memref<16x128xf32, #tpu.memory_space<vmem>>, vector<16x128xf32>
      tpu.vector_store %arg6[%c0_14, %c0_15], %17 {strides = array<i32>} : memref<16x128xf32, #tpu.memory_space<vmem>>, vector<16x128xf32>,
    } else {
    }
    return
  }
  func.func @transform_0(%arg0: i32, %arg1: i32, %arg2: i32) -> (i32, i32) {
    %c0_i32 = arith.constant 0 : i32
    return %arg0, %arg2 : i32, i32
  }
  func.func @transform_1(%arg0: i32, %arg1: i32, %arg2: i32) -> (i32, i32) {
    %c0_i32 = arith.constant 0 : i32
    return %arg1, %arg2 : i32, i32
  }
  func.func @transform_2(%arg0: i32, %arg1: i32, %arg2: i32) -> (i32, i32) {
    %c0_i32 = arith.constant 0 : i32
    %c0_i32_0 = arith.constant 0 : i32
    return %c0_i32, %arg1 : i32, i32
  }
  func.func @transform_3(%arg0: i32, %arg1: i32, %arg2: i32) -> (i32, i32) {
    %c0_i32 = arith.constant 0 : i32
    return %arg0, %arg1 : i32, i32
  }
}

module attributes {stable_mosaic.version = 11 : i64} {
  func.func @_attn_kernel(%arg0: i32, %arg1: memref<1x8x96xf32, #tpu.memory_space<vmem>>, %arg2: memref<1x8x32xf32, #tpu.memory_space<vmem>>) attributes {dimension_semantics = [#tpu.dimension_semantics<parallel>], iteration_bounds = array<i64: 2>, scalar_prefetch = 0 : i64, scratch_operands = 0 : i64, tpu.core_type = #tpu.core_type<tc>, window_params = [{transform_indices = @transform_0, window_bounds = array<i64: 1, 8, 96>}, {transform_indices = @transform_1, window_bounds = array<i64: 1, 8, 32>}]} {
    %c0 = arith.constant 0 : index
    %c0_0 = arith.constant 0 : index
    %c0_1 = arith.constant 0 : index
    %0 = vector.load %arg1[%c0, %c0_0, %c0_1] : memref<1x8x96xf32, #tpu.memory_space<vmem>>, vector<1x8x96xf32>
    %1 = vector.shape_cast %0 : vector<1x8x96xf32> to vector<8x96xf32>
    %2 = vector.extract_strided_slice %1 {offsets = [0, 0], sizes = [8, 8], strides = [1, 1]} : vector<8x96xf32> to vector<8x8xf32>
    %cst = arith.constant 0.353553385 : f32
    %3 = vector.broadcast %cst : f32 to vector<8x8xf32>
    %4 = arith.mulf %2, %3 : vector<8x8xf32>
    %5 = vector.extract_strided_slice %1 {offsets = [0, 32], sizes = [8, 8], strides = [1, 1]} : vector<8x96xf32> to vector<8x8xf32>
    %6 = vector.extract_strided_slice %1 {offsets = [0, 64], sizes = [8, 8], strides = [1, 1]} : vector<8x96xf32> to vector<8x8xf32>
    %7 = arith.truncf %4 : vector<8x8xf32> to vector<8x8xbf16>
    %8 = arith.truncf %5 : vector<8x8xf32> to vector<8x8xbf16>
    %cst_2 = arith.constant dense<0.000000e+00> : vector<8x8xf32>
    %9 = tpu.matmul %7, %8, %cst_2 {dimension_numbers = #tpu.dot_dimension_numbers<[1], [1], [0], [0], [0, 0, 1, 0], [], []>} : vector<8x8xbf16>, vector<8x8xbf16>, vector<8x8xf32> -> vector<8x8xf32>
    %cst_3 = arith.constant dense<0xFF800000> : vector<8xf32>
    %10 = vector.multi_reduction <maximumf>, %9, %cst_3 [1] : vector<8x8xf32> to vector<8xf32>
    %11 = vector.shape_cast %10 : vector<8xf32> to vector<8x1xf32>
    %12 = vector.broadcast %11 : vector<8x1xf32> to vector<8x8xf32>
    %13 = arith.subf %9, %12 : vector<8x8xf32>
    %14 = math.exp %13 : vector<8x8xf32>
    %cst_4 = arith.constant dense<0.000000e+00> : vector<8xf32>
    %15 = vector.multi_reduction <add>, %14, %cst_4 [1] : vector<8x8xf32> to vector<8xf32>
    %16 = vector.shape_cast %15 : vector<8xf32> to vector<8x1xf32>
    %17 = arith.truncf %14 : vector<8x8xf32> to vector<8x8xbf16>
    %18 = arith.truncf %6 : vector<8x8xf32> to vector<8x8xbf16>
    %cst_5 = arith.constant dense<0.000000e+00> : vector<8x8xf32>
    %19 = tpu.matmul %17, %18, %cst_5 {dimension_numbers = #tpu.dot_dimension_numbers<[1], [0], [0], [1], [0, 0, 1, 1], [], []>} : vector<8x8xbf16>, vector<8x8xbf16>, vector<8x8xf32> -> vector<8x8xf32>
    %20 = tpu.reciprocal %16 {approx = true} : vector<8x1xf32> -> vector<8x1xf32>
    %21 = vector.broadcast %20 : vector<8x1xf32> to vector<8x8xf32>
    %22 = arith.mulf %19, %21 : vector<8x8xf32>
    %23 = vector.extract_strided_slice %1 {offsets = [0, 8], sizes = [8, 8], strides = [1, 1]} : vector<8x96xf32> to vector<8x8xf32>
    %cst_6 = arith.constant 0.353553385 : f32
    %24 = vector.broadcast %cst_6 : f32 to vector<8x8xf32>
    %25 = arith.mulf %23, %24 : vector<8x8xf32>
    %26 = vector.extract_strided_slice %1 {offsets = [0, 40], sizes = [8, 8], strides = [1, 1]} : vector<8x96xf32> to vector<8x8xf32>
    %27 = vector.extract_strided_slice %1 {offsets = [0, 72], sizes = [8, 8], strides = [1, 1]} : vector<8x96xf32> to vector<8x8xf32>
    %28 = arith.truncf %25 : vector<8x8xf32> to vector<8x8xbf16>
    %29 = arith.truncf %26 : vector<8x8xf32> to vector<8x8xbf16>
    %cst_7 = arith.constant dense<0.000000e+00> : vector<8x8xf32>
    %30 = tpu.matmul %28, %29, %cst_7 {dimension_numbers = #tpu.dot_dimension_numbers<[1], [1], [0], [0], [0, 0, 1, 0], [], []>} : vector<8x8xbf16>, vector<8x8xbf16>, vector<8x8xf32> -> vector<8x8xf32>
    %cst_8 = arith.constant dense<0xFF800000> : vector<8xf32>
    %31 = vector.multi_reduction <maximumf>, %30, %cst_8 [1] : vector<8x8xf32> to vector<8xf32>
    %32 = vector.shape_cast %31 : vector<8xf32> to vector<8x1xf32>
    %33 = vector.broadcast %32 : vector<8x1xf32> to vector<8x8xf32>
    %34 = arith.subf %30, %33 : vector<8x8xf32>
    %35 = math.exp %34 : vector<8x8xf32>
    %cst_9 = arith.constant dense<0.000000e+00> : vector<8xf32>
    %36 = vector.multi_reduction <add>, %35, %cst_9 [1] : vector<8x8xf32> to vector<8xf32>
    %37 = vector.shape_cast %36 : vector<8xf32> to vector<8x1xf32>
    %38 = arith.truncf %35 : vector<8x8xf32> to vector<8x8xbf16>
    %39 = arith.truncf %27 : vector<8x8xf32> to vector<8x8xbf16>
    %cst_10 = arith.constant dense<0.000000e+00> : vector<8x8xf32>
    %40 = tpu.matmul %38, %39, %cst_10 {dimension_numbers = #tpu.dot_dimension_numbers<[1], [0], [0], [1], [0, 0, 1, 1], [], []>} : vector<8x8xbf16>, vector<8x8xbf16>, vector<8x8xf32> -> vector<8x8xf32>
    %41 = tpu.reciprocal %37 {approx = true} : vector<8x1xf32> -> vector<8x1xf32>
    %42 = vector.broadcast %41 : vector<8x1xf32> to vector<8x8xf32>
    %43 = arith.mulf %40, %42 : vector<8x8xf32>
    %44 = vector.extract_strided_slice %1 {offsets = [0, 16], sizes = [8, 8], strides = [1, 1]} : vector<8x96xf32> to vector<8x8xf32>
    %cst_11 = arith.constant 0.353553385 : f32
    %45 = vector.broadcast %cst_11 : f32 to vector<8x8xf32>
    %46 = arith.mulf %44, %45 : vector<8x8xf32>
    %47 = vector.extract_strided_slice %1 {offsets = [0, 48], sizes = [8, 8], strides = [1, 1]} : vector<8x96xf32> to vector<8x8xf32>
    %48 = vector.extract_strided_slice %1 {offsets = [0, 80], sizes = [8, 8], strides = [1, 1]} : vector<8x96xf32> to vector<8x8xf32>
    %49 = arith.truncf %46 : vector<8x8xf32> to vector<8x8xbf16>
    %50 = arith.truncf %47 : vector<8x8xf32> to vector<8x8xbf16>
    %cst_12 = arith.constant dense<0.000000e+00> : vector<8x8xf32>
    %51 = tpu.matmul %49, %50, %cst_12 {dimension_numbers = #tpu.dot_dimension_numbers<[1], [1], [0], [0], [0, 0, 1, 0], [], []>} : vector<8x8xbf16>, vector<8x8xbf16>, vector<8x8xf32> -> vector<8x8xf32>
    %cst_13 = arith.constant dense<0xFF800000> : vector<8xf32>
    %52 = vector.multi_reduction <maximumf>, %51, %cst_13 [1] : vector<8x8xf32> to vector<8xf32>
    %53 = vector.shape_cast %52 : vector<8xf32> to vector<8x1xf32>
    %54 = vector.broadcast %53 : vector<8x1xf32> to vector<8x8xf32>
    %55 = arith.subf %51, %54 : vector<8x8xf32>
    %56 = math.exp %55 : vector<8x8xf32>
    %cst_14 = arith.constant dense<0.000000e+00> : vector<8xf32>
    %57 = vector.multi_reduction <add>, %56, %cst_14 [1] : vector<8x8xf32> to vector<8xf32>
    %58 = vector.shape_cast %57 : vector<8xf32> to vector<8x1xf32>
    %59 = arith.truncf %56 : vector<8x8xf32> to vector<8x8xbf16>
    %60 = arith.truncf %48 : vector<8x8xf32> to vector<8x8xbf16>
    %cst_15 = arith.constant dense<0.000000e+00> : vector<8x8xf32>
    %61 = tpu.matmul %59, %60, %cst_15 {dimension_numbers = #tpu.dot_dimension_numbers<[1], [0], [0], [1], [0, 0, 1, 1], [], []>} : vector<8x8xbf16>, vector<8x8xbf16>, vector<8x8xf32> -> vector<8x8xf32>
    %62 = tpu.reciprocal %58 {approx = true} : vector<8x1xf32> -> vector<8x1xf32>
    %63 = vector.broadcast %62 : vector<8x1xf32> to vector<8x8xf32>
    %64 = arith.mulf %61, %63 : vector<8x8xf32>
    %65 = vector.extract_strided_slice %1 {offsets = [0, 24], sizes = [8, 8], strides = [1, 1]} : vector<8x96xf32> to vector<8x8xf32>
    %cst_16 = arith.constant 0.353553385 : f32
    %66 = vector.broadcast %cst_16 : f32 to vector<8x8xf32>
    %67 = arith.mulf %65, %66 : vector<8x8xf32>
    %68 = vector.extract_strided_slice %1 {offsets = [0, 56], sizes = [8, 8], strides = [1, 1]} : vector<8x96xf32> to vector<8x8xf32>
    %69 = vector.extract_strided_slice %1 {offsets = [0, 88], sizes = [8, 8], strides = [1, 1]} : vector<8x96xf32> to vector<8x8xf32>
    %70 = arith.truncf %67 : vector<8x8xf32> to vector<8x8xbf16>
    %71 = arith.truncf %68 : vector<8x8xf32> to vector<8x8xbf16>
    %cst_17 = arith.constant dense<0.000000e+00> : vector<8x8xf32>
    %72 = tpu.matmul %70, %71, %cst_17 {dimension_numbers = #tpu.dot_dimension_numbers<[1], [1], [0], [0], [0, 0, 1, 0], [], []>} : vector<8x8xbf16>, vector<8x8xbf16>, vector<8x8xf32> -> vector<8x8xf32>
    %cst_18 = arith.constant dense<0xFF800000> : vector<8xf32>
    %73 = vector.multi_reduction <maximumf>, %72, %cst_18 [1] : vector<8x8xf32> to vector<8xf32>
    %74 = vector.shape_cast %73 : vector<8xf32> to vector<8x1xf32>
    %75 = vector.broadcast %74 : vector<8x1xf32> to vector<8x8xf32>
    %76 = arith.subf %72, %75 : vector<8x8xf32>
    %77 = math.exp %76 : vector<8x8xf32>
    %cst_19 = arith.constant dense<0.000000e+00> : vector<8xf32>
    %78 = vector.multi_reduction <add>, %77, %cst_19 [1] : vector<8x8xf32> to vector<8xf32>
    %79 = vector.shape_cast %78 : vector<8xf32> to vector<8x1xf32>
    %80 = arith.truncf %77 : vector<8x8xf32> to vector<8x8xbf16>
    %81 = arith.truncf %69 : vector<8x8xf32> to vector<8x8xbf16>
    %cst_20 = arith.constant dense<0.000000e+00> : vector<8x8xf32>
    %82 = tpu.matmul %80, %81, %cst_20 {dimension_numbers = #tpu.dot_dimension_numbers<[1], [0], [0], [1], [0, 0, 1, 1], [], []>} : vector<8x8xbf16>, vector<8x8xbf16>, vector<8x8xf32> -> vector<8x8xf32>
    %83 = tpu.reciprocal %79 {approx = true} : vector<8x1xf32> -> vector<8x1xf32>
    %84 = vector.broadcast %83 : vector<8x1xf32> to vector<8x8xf32>
    %85 = arith.mulf %82, %84 : vector<8x8xf32>
    %86 = tpu.concatenate %22, %43, %64, %85 in 1 : vector<8x8xf32>, vector<8x8xf32>, vector<8x8xf32>, vector<8x8xf32> -> vector<8x32xf32>
    %c0_21 = arith.constant 0 : index
    %c0_22 = arith.constant 0 : index
    %c0_23 = arith.constant 0 : index
    %87 = vector.load %arg2[%c0_21, %c0_22, %c0_23] : memref<1x8x32xf32, #tpu.memory_space<vmem>>, vector<1x8x32xf32>
    %88 = vector.shape_cast %87 : vector<1x8x32xf32> to vector<8x32xf32>
    %89 = vector.shape_cast %86 : vector<8x32xf32> to vector<1x8x32xf32>
    tpu.vector_store %arg2[%c0_21, %c0_22, %c0_23], %89 {strides = array<i32>} : memref<1x8x32xf32, #tpu.memory_space<vmem>>, vector<1x8x32xf32>,
    return
  }
  func.func @transform_0(%arg0: i32) -> (i32, i32, i32) {
    %c0_i32 = arith.constant 0 : i32
    %c0_i32_0 = arith.constant 0 : i32
    %c0_i32_1 = arith.constant 0 : i32
    return %arg0, %c0_i32, %c0_i32_0 : i32, i32, i32
  }
  func.func @transform_1(%arg0: i32) -> (i32, i32, i32) {
    %c0_i32 = arith.constant 0 : i32
    %c0_i32_0 = arith.constant 0 : i32
    %c0_i32_1 = arith.constant 0 : i32
    return %arg0, %c0_i32, %c0_i32_0 : i32, i32, i32
  }
}

</mosaic_0001>

<bundles_post_ra>
// kernel: self_attention_forward.3
= control target key start
LH: loop header
LB: loop body
LE: loop exit
PB: predicated region body
PF: predicated region fallthrough
CT: control target
= control target key end

     0   :  { %v147_v0 = vmov 0.0   ;;  %vm148_vm0 = vmmov 0   ;;  %s232_s1 = inlined_call_operand.vmem [shape: f32[128,128], index: 1, kind: input, shape index: {}]   ;;  %s233_s0 = inlined_call_operand.vmem [shape: f32[16,128], index: 0, kind: input, shape index: {}]   ;;  %s234_s2 = inlined_call_operand.vmem [shape: f32[1,128], index: 2, kind: input, shape index: {}]   ;;  %s235_s3 = inlined_call_operand.vmem [shape: f32[16,128], index: 3, kind: output, shape index: {}]  }
   0x1   :  { %125 = vmatprep.subr.bf16.mxu0 %v147_v0  ;;  %v40_v1 = vld [vmem:[%s232_s1 + $0x70] sm:$0xff]  ;;  %v41_v2 = vld [vmem:[%s232_s1 + $0x78] sm:$0xff]  ;;  %141 = vmatprep.mubr.msk.bf16.mxu0 %vm148_vm0, %v147_v0  ;;  %v38_v4 = vld [vmem:[%s232_s1 + $0x60] sm:$0xff] }
   0x2   :  { %v49_v3 = vpack.c.bf16 %v41_v2, %v40_v1  ;;  %v39_v5 = vld [vmem:[%s232_s1 + $0x68] sm:$0xff]  ;;  %v36_v7 = vld [vmem:[%s232_s1 + $0x50] sm:$0xff]  ;;  %v37_v8 = vld [vmem:[%s232_s1 + $0x58] sm:$0xff] }
   0x3   :  { %v48_v6 = vpack.c.bf16 %v39_v5, %v38_v4  ;;  %v47_v9 = vpack.c.bf16 %v37_v8, %v36_v7  ;;  %v34_v10 = vld [vmem:[%s232_s1 + $0x40] sm:$0xff]  ;;  %v35_v11 = vld [vmem:[%s232_s1 + $0x48] sm:$0xff]  ;;  %v32_v13 = vld [vmem:[%s232_s1 + $0x30] sm:$0xff] }
   0x4   :  { %126 = vmatpush3.bf16.xpose.msra.mxu0 %v49_v3  ;;  %v46_v12 = vpack.c.bf16 %v35_v11, %v34_v10  ;;  %v33_v14 = vld [vmem:[%s232_s1 + $0x38] sm:$0xff]  ;;  %v30_v16 = vld [vmem:[%s232_s1 + $0x20] sm:$0xff]  ;;  %v31_v17 = vld [vmem:[%s232_s1 + $0x28] sm:$0xff] }
   0x5   :  { %127 = vmatprep.subr.bf16.mxu0 %v147_v0  ;;  %v45_v15 = vpack.c.bf16 %v33_v14, %v32_v13  ;;  %v44_v18 = vpack.c.bf16 %v31_v17, %v30_v16  ;;  %v28_v19 = vld [vmem:[%s232_s1 + $0x10] sm:$0xff]  ;;  %v29_v20 = vld [vmem:[%s232_s1 + $0x18] sm:$0xff]  ;;  %v26_v22 = vld [vmem:[%s232_s1] sm:$0xff] }
   0x6   :  { %v43_v21 = vpack.c.bf16 %v29_v20, %v28_v19  ;;  %v27_v23 = vld [vmem:[%s232_s1 + $0x8] sm:$0xff]  ;;  %v23_v25 = vld [vmem:[%s233_s0] sm:$0xff] }
   0x7   :  { %v42_v24 = vpack.c.bf16 %v27_v23, %v26_v22  ;;  %v24_v26 = vld [vmem:[%s233_s0 + $0x8] sm:$0xff]  ;;  %v115_v28 = vld [vmem:[%s234_s2] ss:$0 sm:$0xff] }
   0x8   :  { %v25_v27 = vpack.c.bf16 %v24_v26, %v23_v25 }
   0xc   :  { %128 = vmatpush3.bf16.xpose.msra.mxu0 %v48_v6 }
   0xd   :  { %129 = vmatprep.subr.bf16.mxu0 %v147_v0 }
  0x14   :  { %130 = vmatpush3.bf16.xpose.msra.mxu0 %v47_v9 }
  0x15   :  { %131 = vmatprep.subr.bf16.mxu0 %v147_v0 }
  0x1c   :  { %132 = vmatpush3.bf16.xpose.msra.mxu0 %v46_v12 }
  0x1d   :  { %133 = vmatprep.subr.bf16.mxu0 %v147_v0 }
  0x24   :  { %134 = vmatpush3.bf16.xpose.msra.mxu0 %v45_v15 }
  0x25   :  { %135 = vmatprep.subr.bf16.mxu0 %v147_v0 }
  0x2c   :  { %136 = vmatpush3.bf16.xpose.msra.mxu0 %v44_v18 }
  0x2d   :  { %137 = vmatprep.subr.bf16.mxu0 %v147_v0 }
  0x34   :  { %138 = vmatpush3.bf16.xpose.msra.mxu0 %v43_v21 }
  0x35   :  { %139 = vmatprep.subr.bf16.mxu0 %v147_v0 }
  0x3c   :  { %140 = vmatpush3.bf16.xpose.msra.mxu0 %v42_v24 }
  0x43   :  { %142 = vmatmul.mubr.bf16.vlgmr.msra.gmra.mxu0 %v25_v27 }
 0x103   :  { %v84_v29 = vpop.f32.mrf.mxu0 }
 0x104   :  { %v107_v30 = vadd.f32 %v115_v28, %v84_v29 }
 0x105   :  { %v143_v31 = vpop.f32.mrf.mxu0 }
 0x106   :  { %109 = vst [vmem:[%s235_s3] sm:$0xff] %v107_v30 }
 0x107   :  { %v87_v32 = vpop.f32.mrf.mxu0 }
 0x108   :  { %v108_v33 = vadd.f32 %v115_v28, %v87_v32 }
 0x109   :  { %v144_v34 = vpop.f32.mrf.mxu0 }
 0x10a   :  { %110 = vst [vmem:[%s235_s3 + $0x8] sm:$0xff] %v108_v33 }

// kernel: self_attention_forward.4
= control target key start
LH: loop header
LB: loop body
LE: loop exit
PB: predicated region body
PF: predicated region fallthrough
CT: control target
= control target key end

     0   :  { %s786_s6 = smov 0   ;;  %s877_s0 = inlined_call_operand.vmem [shape: f32[2,8,96], index: 0, kind: input, shape index: {}]   ;;  %s878_s1 = inlined_call_operand.vmem [shape: f32[2,8,32], index: 1, kind: output, shape index: {}]  }
   0x1 LB: > { %s631_s7 = sadd.s32 4294967295, %s758_s6   ;;  %p635_p0 = scmp.ge.s32.totalorder %s758_s6, 1  ;;  %s758_s6 = sphi %s786_s6, %s11_s6  }
   0x2   : > { %p86_p1 = scmp.lt.s32.totalorder %s758_s6, 3 }
   0x4   : > { %p87_p2 = pnand %p635_p0, %p86_p1 }
   0x5   : > { %p104_p3 = scmp.lt.s32.totalorder (!%p87_p2), %s631_s7, 1  ;;  %s762_s12 = smov (!%p87_p2), 96  }
   0x6   : > { %90 = sbr.rel (%p87_p2) target bundleno = 1225 (0x4c9), region = 24  ;;  %s763_s13 = smov (!%p87_p2), 64  }
   0x7   : > { %s764_s14 = smov (!%p87_p2), 88   ;;  %s765_s15 = smov (!%p87_p2), 120  }
   0x8   : > { %s766_s16 = smov (!%p87_p2), 80   ;;  %s767_s17 = smov (!%p87_p2), 112  }
   0x9   : > { %s768_s18 = smov (!%p87_p2), 72   ;;  %s769_s19 = smov (!%p87_p2), 104  }
   0xa   : > { %s770_s20 = smov (!%p87_p2), 48   ;;  %s771_s21 = smov (!%p87_p2), 56  }
   0xb   : > { %v760_v0 = vmov 0.0   ;;  %vm761_vm0 = vmmov 0   ;;  %s880_s7 = smov (!%p104_p3, %s631_s7), 1  ;;  %vm120_vm1 = vcmask 64512   ;;  %vm182_vm2 = vcmask 1043456   ;;  %s772_s22 = smov 40  }
   0xc   : > { %664 = vmatprep.subr.bf16.mxu0 %v760_v0  ;;  %666 = vmatprep.mubr.msk.bf16.mxu0 %vm761_vm0, %v760_v0  ;;  %s636_s8 = sshll.u32 %s880_s7, 3  ;;  %s773_s23 = smov 8   ;;  %vm572_vm3 = vcmask 130048   ;;  %vm574_vm4 = vcmask 195584   ;;  %vm576_vm5 = vcmask 261120  }
   0xd   : > { %670 = vmatprep.subr.bf16.mxu1 %v760_v0  ;;  %672 = vmatprep.mubr.msk.bf16.mxu1 %vm761_vm0, %v760_v0  ;;  %s107_s11 = scalar_lea.vmem %s877_s0, %s636_s8  ;;  %s774_s24 = smov 16  }
   0xe   : > { %v113_v1 = vld [vmem:[%s107_s11] sm:$0xff]  ;;  %s775_s25 = smov 24   ;;  %s111_s28 = scalar_lea.vmem %s878_s1, %s636_s8 }
   0xf   : > { %v808_v2 = vpack.c.bf16 %v113_v1, %v113_v1  ;;  %v114_v5 = vmul.f32 0.35355338, %v113_v1 }
  0x11   : > { %118 = vrot.lane.b32.xlu0 %v808_v2, %s762_s12  ;;  %v115_v6 = vpack.c.bf16 %v114_v5, %v114_v5  ;;  %177 = vrot.lane.b32.xlu1 %v808_v2, %s763_s13 }
  0x15   : > { %231 = vrot.lane.b32.xlu1 %v808_v2, %s764_s14 }
  0x19   : > { %229 = vrot.lane.b32.xlu1 %v115_v6, %s765_s15 }
  0x1d   : > { %341 = vrot.lane.b32.xlu1 %v808_v2, %s766_s16 }
  0x21   : > { %339 = vrot.lane.b32.xlu1 %v115_v6, %s767_s17 }
  0x25   : > { %451 = vrot.lane.b32.xlu1 %v808_v2, %s768_s18 }
  0x29   : > { %449 = vrot.lane.b32.xlu1 %v115_v6, %s769_s19 }
  0x83   : > { %v119_v3 = vpop.permute.xlu0 %118  ;;  %v178_v12 = vpop.permute.xlu1 %177 }
  0x84   : > { %v125_v4 = vsel %vm120_vm1, %v119_v3, 0  ;;  %v184_v13 = vsel %vm182_vm2, %v178_v12, 0 }
  0x85   : > { %665 = vmatpush3.bf16.xpose.msra.mxu0 %v125_v4  ;;  %671 = vmatpush3.bf16.msra.mxu1 %v184_v13 }
  0x86   : > { %682 = vmatprep.subr.bf16.mxu0 %v760_v0  ;;  %676 = vmatprep.subr.bf16.mxu1 %v760_v0 }
  0x87   : > { %v232_v17 = vpop.permute.xlu1 %231 }
  0x88   : > { %v237_v20 = vsel %vm120_vm1, %v232_v17, 0 }
  0x8b   : > { %v230_v19 = vpop.permute.xlu1 %229 }
  0x8c   : > { %667 = vmatmul.mubr.msk.bf16.vlgmr.msra.gmra.mxu0 %vm120_vm1, %v115_v6 }
  0x8d   : > { %684 = vmatprep.mubr.msk.bf16.mxu0 %vm761_vm0, %v760_v0 }
  0x8f   : > { %v342_v22 = vpop.permute.xlu1 %341 }
  0x90   : > { %v347_v23 = vsel %vm120_vm1, %v342_v22, 0 }
  0x93   : > { %v340_v24 = vpop.permute.xlu1 %339 }
  0x97   : > { %v452_v25 = vpop.permute.xlu1 %451 }
  0x98   : > { %v457_v26 = vsel %vm120_vm1, %v452_v25, 0 }
  0x9b   : > { %v450_v27 = vpop.permute.xlu1 %449 }
 0x14c   : > { %v161_v7 = vpop.f32.mrf.mxu0 }
 0x14d   : > { %v167_v8 = vsel %vm120_vm1, %v161_v7, -inf }
 0x14e   : > { %168 = vmax.xlane.f32.xlu0 %v167_v8  ;;  %v668_v9 = vpop.f32.mrf.mxu0 }
 0x150   : > { %v164_v10 = vpop.f32.mrf.mxu0 }
 0x152   : > { %v669_v11 = vpop.f32.mrf.mxu0 }
 0x1d7   : > { %v169_v14 = vpop.xlane.xlu0 %168 }
 0x1d8   : > { %v170_v15 = vsub.f32 %v161_v7, %v169_v14 }
 0x1da   : > { %v171_v16 = vmul.f32 1.442695, %v170_v15 }
 0x1dc   : > { %736 = vpow2.f32 %v171_v16 }
 0x1e9   : > { %v823_v18 = vpop.eup %736 }
 0x1ea   : > { %v176_v21 = vpack.c.bf16 %v823_v18, %v823_v18  ;;  %v173_v8 = vsel %vm120_vm1, %v823_v18, 0.0 }
 0x1ec   : > { %673 = vmatmul.mubr.msk.bf16.vlgmr.msra.gmra.mxu1 %vm120_vm1, %v176_v21 }
 0x1ed   : > { %677 = vmatpush3.bf16.xpose.msra.mxu1 %v237_v20  ;;  %678 = vmatprep.mubr.msk.bf16.mxu1 %vm761_vm0, %v760_v0 }
 0x1ee   : > { %688 = vmatprep.subr.bf16.mxu1 %v760_v0 }
 0x1f4   : > { %679 = vmatmul.mubr.msk.bf16.vlgmr.msra.gmra.mxu1 %vm120_vm1, %v230_v19 }
 0x1f5   : > { %689 = vmatpush3.bf16.xpose.msra.mxu1 %v347_v23  ;;  %690 = vmatprep.mubr.msk.bf16.mxu1 %vm761_vm0, %v760_v0 }
 0x1f6   : > { %700 = vmatprep.subr.bf16.mxu1 %v760_v0 }
 0x1fc   : > { %691 = vmatmul.mubr.msk.bf16.vlgmr.msra.gmra.mxu1 %vm120_vm1, %v340_v24 }
 0x1fd   : > { %701 = vmatpush3.bf16.xpose.msra.mxu1 %v457_v26  ;;  %702 = vmatprep.mubr.msk.bf16.mxu1 %vm761_vm0, %v760_v0 }
 0x204   : > { %703 = vmatmul.mubr.msk.bf16.vlgmr.msra.gmra.mxu1 %vm120_vm1, %v450_v27 }
 0x2ac   : > { %v842_v28 = vpop.f32.mrf.mxu1 }
 0x2ae   : > { %v674_v29 = vpop.f32.mrf.mxu1 }
 0x2b0   : > { %v223_v30 = vpop.f32.mrf.mxu1 }
 0x2b2   : > { %v675_v31 = vpop.f32.mrf.mxu1 }
 0x2b4   : > { %v273_v32 = vpop.f32.mrf.mxu1 }
 0x2b5   : > { %v279_v33 = vsel %vm120_vm1, %v273_v32, -inf }
 0x2b6   : > { %280 = vmax.xlane.f32.xlu1 %v279_v33  ;;  %v680_v34 = vpop.f32.mrf.mxu1 }
 0x2b8   : > { %v276_v35 = vpop.f32.mrf.mxu1 }
 0x2ba   : > { %v681_v36 = vpop.f32.mrf.mxu1 }
 0x2bc   : > { %v383_v37 = vpop.f32.mrf.mxu1 }
 0x2bd   : > { %v389_v38 = vsel %vm120_vm1, %v383_v37, -inf }
 0x2be   : > { %390 = vmax.xlane.f32.xlu0 %v389_v38  ;;  %v692_v39 = vpop.f32.mrf.mxu1 }
 0x2c0   : > { %v386_v40 = vpop.f32.mrf.mxu1 }
 0x2c2   : > { %v693_v41 = vpop.f32.mrf.mxu1 }
 0x2c4   : > { %v493_v42 = vpop.f32.mrf.mxu1 }
 0x2c5   : > { %v499_v46 = vsel %vm120_vm1, %v493_v42, -inf }
 0x2c6   : > { %v704_v43 = vpop.f32.mrf.mxu1 }
 0x2c7   : > { %399 = vrot.lane.b32.xlu1 %v808_v2, %s770_s20 }
 0x2c8   : > { %v496_v44 = vpop.f32.mrf.mxu1 }
 0x2ca   : > { %v705_v45 = vpop.f32.mrf.mxu1 }
 0x2d4   : > { %289 = vrot.lane.b32.xlu0 %v808_v2, %s771_s21 }
 0x2f3   : > { %500 = vmax.xlane.f32.xlu0 %v499_v46 }
 0x309   : > { %509 = vrot.lane.b32.xlu0 %v808_v2, %s772_s22 }
 0x33f   : > { %v281_v47 = vpop.xlane.xlu1 %280 }
 0x340   : > { %v282_v48 = vsub.f32 %v273_v32, %v281_v47 }
 0x342   : > { %v283_v49 = vmul.f32 1.442695, %v282_v48 }
 0x343   : > { %v400_v55 = vpop.permute.xlu1 %399 }
 0x344   : > { %738 = vpow2.f32 %v283_v49  ;;  %v405_v59 = vsel %vm182_vm2, %v400_v55, 0 }
 0x347   : > { %v391_v50 = vpop.xlane.xlu0 %390 }
 0x348   : > { %v392_v51 = vsub.f32 %v383_v37, %v391_v50 }
 0x34a   : > { %v393_v52 = vmul.f32 1.442695, %v392_v51 }
 0x34b   : > { %v290_v53 = vpop.permute.xlu0 %289 }
 0x34c   : > { %740 = vpow2.f32 %v393_v52  ;;  %v295_v54 = vsel %vm182_vm2, %v290_v53, 0 }
 0x34d   : > { %683 = vmatpush3.bf16.msra.mxu0 %v295_v54 }
 0x34e   : > { %694 = vmatprep.subr.bf16.mxu0 %v760_v0 }
 0x351   : > { %v739_v56 = vpop.eup %738 }
 0x352   : > { %v285_v57 = vsel %vm120_vm1, %v739_v56, 0.0  ;;  %v288_v58 = vpack.c.bf16 %v739_v56, %v739_v56 }
 0x353   : > { %286 = vadd.xlane.f32.xlu0 %v285_v57 }
 0x354   : > { %685 = vmatmul.mubr.msk.bf16.vlgmr.msra.gmra.mxu0 %vm120_vm1, %v288_v58 }
 0x355   : > { %695 = vmatpush3.bf16.msra.mxu0 %v405_v59  ;;  %696 = vmatprep.mubr.msk.bf16.mxu0 %vm761_vm0, %v760_v0 }
 0x356   : > { %706 = vmatprep.subr.bf16.mxu0 %v760_v0 }
 0x359   : > { %v741_v60 = vpop.eup %740 }
 0x35a   : > { %v395_v61 = vsel %vm120_vm1, %v741_v60, 0.0  ;;  %v398_v62 = vpack.c.bf16 %v741_v60, %v741_v60 }
 0x35b   : > { %396 = vadd.xlane.f32.xlu1 %v395_v61 }
 0x35c   : > { %697 = vmatmul.mubr.msk.bf16.vlgmr.msra.gmra.mxu0 %vm120_vm1, %v398_v62 }
 0x35d   : > { %708 = vmatprep.mubr.msk.bf16.mxu0 %vm761_vm0, %v760_v0 }
 0x37c   : > { %v501_v63 = vpop.xlane.xlu0 %500 }
 0x37d   : > { %v502_v1 = vsub.f32 %v493_v42, %v501_v63 }
 0x37f   : > { %v503_v2 = vmul.f32 1.442695, %v502_v1 }
 0x380   : > { %v510_v3 = vpop.permute.xlu0 %509 }
 0x381   : > { %742 = vpow2.f32 %v503_v2  ;;  %v515_v4 = vsel %vm182_vm2, %v510_v3, 0 }
 0x382   : > { %707 = vmatpush3.bf16.msra.mxu0 %v515_v4 }
 0x38e   : > { %v743_v5 = vpop.eup %742 }
 0x38f   : > { %v505_v6 = vsel %vm120_vm1, %v743_v5, 0.0  ;;  %v508_v7 = vpack.c.bf16 %v743_v5, %v743_v5 }
 0x390   : > { %506 = vadd.xlane.f32.xlu0 %v505_v6 }
 0x391   : > { %709 = vmatmul.mubr.msk.bf16.vlgmr.msra.gmra.mxu0 %vm120_vm1, %v508_v7 }
 0x394   : > { %174 = vadd.xlane.f32.xlu0 %v173_v8 }
 0x3dc   : > { %v287_v0 = vpop.xlane.xlu0 %286 }
 0x3dd   : > { %744 = vrcp.f32 %v287_v0 }
 0x3e4   : > { %v397_v9 = vpop.xlane.xlu1 %396 }
 0x3e5   : > { %746 = vrcp.f32 %v397_v9 }
 0x3ea   : > { %v745_v10 = vpop.eup %744 }
 0x3f2   : > { %v747_v16 = vpop.eup %746 }
 0x414   : > { %v331_v11 = vpop.f32.mrf.mxu0 }
 0x415   : > { %v338_v12 = vmul.f32 %v745_v10, %v331_v11 }
 0x416   : > { %v686_v13 = vpop.f32.mrf.mxu0 }
 0x417   : > { %560 = vrot.lane.b32.xlu0 %v338_v12, %s773_s23 }
 0x418   : > { %v334_v14 = vpop.f32.mrf.mxu0 }
 0x419   : > { %v507_v22 = vpop.xlane.xlu0 %506 }
 0x41a   : > { %v687_v15 = vpop.f32.mrf.mxu0  ;;  %748 = vrcp.f32 %v507_v22 }
 0x41c   : > { %v441_v17 = vpop.f32.mrf.mxu0 }
 0x41d   : > { %v448_v19 = vmul.f32 %v747_v16, %v441_v17  ;;  %v175_v30 = vpop.xlane.xlu0 %174 }
 0x41e   : > { %v698_v20 = vpop.f32.mrf.mxu0  ;;  %750 = vrcp.f32 %v175_v30 }
 0x41f   : > { %564 = vrot.lane.b32.xlu1 %v448_v19, %s774_s24 }
 0x420   : > { %v444_v18 = vpop.f32.mrf.mxu0 }
 0x422   : > { %v699_v21 = vpop.f32.mrf.mxu0 }
 0x427   : > { %v749_v23 = vpop.eup %748 }
 0x42b   : > { %v751_v31 = vpop.eup %750 }
 0x42c   : > { %v227_v33 = vmul.f32 %v751_v31, %v842_v28 }
 0x451   : > { %v551_v24 = vpop.f32.mrf.mxu0 }
 0x452   : > { %v558_v25 = vmul.f32 %v749_v23, %v551_v24 }
 0x453   : > { %v710_v26 = vpop.f32.mrf.mxu0 }
 0x454   : > { %568 = vrot.lane.b32.xlu0 %v558_v25, %s775_s25 }
 0x455   : > { %v554_v27 = vpop.f32.mrf.mxu0 }
 0x457   : > { %v711_v29 = vpop.f32.mrf.mxu0 }
 0x489   : > { %v561_v32 = vpop.permute.xlu0 %560 }
 0x48a   : > { %v571_v35 = vsel %vm120_vm1, %v227_v33, %v561_v32 }
 0x491   : > { %v565_v34 = vpop.permute.xlu1 %564 }
 0x492   : > { %v573_v36 = vsel %vm572_vm3, %v571_v35, %v565_v34 }
 0x4c6   : > { %v569_v37 = vpop.permute.xlu0 %568 }
 0x4c7   : > { %v575_v38 = vsel %vm574_vm4, %v573_v36, %v569_v37 }
 0x4c8   : > { %577 = vst.msk [vmem:[%s111_s28] sm:$0xff] %vm576_vm5, %v575_v38 }
 0x4c9 PF: > { %s11_s6 = sadd.s32 1, %s758_s6  }
 0x4ca   : > { %p8_p4 = scmp.ge.s32.totalorder %s11_s6, 4  }
 0x4cc   :  { %10 = sbr.rel (!%p8_p4) target bundleno = 1 (0x1), region = 54 }

</bundles_post_ra>
